<compile_context>
chip_gen: v6e
topology: v6e:2x2x1
jax: 0.10.0
libtpu: 0.0.40
codegen_flags: <defaults>
</compile_context>

<pallas_src>
import math

import jax
import jax.numpy as jnp
from jax import lax
from jax.experimental import pallas as pl
from jax.experimental.pallas import tpu as pltpu


def _round_up(a, b):
    return ((a + b - 1) // b) * b


def _sublanes_for_itemsize(itemsize):
    # Packed-sublane granularity: f32 -> 8, bf16 -> 16, int8/fp8 -> 32.
    return max(8, 32 // max(1, itemsize))


def _vmem_budget():
    """Generation-aware (vmem_limit_bytes, per-input-buffer byte budget)."""
    cap = None
    try:
        info = pltpu.get_tpu_info()
        cap = getattr(info, "vmem_capacity_bytes", None)
    except Exception:
        cap = None
    if cap is None:
        cap = 64 << 20  # assume the smallest generation (v7x) and stay safe
    if cap >= (128 << 20):      # v5e / v6e: 128 MiB physical VMEM
        vmem_limit = 96 << 20
        per_buffer = 28 << 20
    else:                       # v7x: 64 MiB physical VMEM per TensorCore
        vmem_limit = 48 << 20
        per_buffer = 16 << 20
    return vmem_limit, per_buffer


def _choose_tiles(m, feature_dim, itemsize, per_buffer):
    """Pick (tm, tf): tm is a 128-multiple row tile; tf splits F only when a
    single 128-row block of the full feature dim would not fit the budget."""
    row_bytes = feature_dim * itemsize
    if 128 * row_bytes <= per_buffer:
        tf = feature_dim
    else:
        tf = (per_buffer // (128 * itemsize)) // 128 * 128
        tf = max(128, min(tf, feature_dim))
    tm = per_buffer // max(1, tf * itemsize)
    tm = (tm // 128) * 128
    tm = max(128, min(tm, _round_up(m, 128)))
    return tm, tf


def _make_kernel(feature_dim, tf, mask_f):
    def kernel(b_ref, x_ref, w_ref, o_ref, acc_ref):
        # b_ref:   (1,)        bias scalar (SMEM, f32)
        # x_ref:   (tm, tf)    row/feature tile of flattened inputs (VMEM)
        # w_ref:   (sub, tf)   weight slab, identical rows (VMEM, lane-dense)
        # o_ref:   (1, 1, tm)  lane-dense output tile
        # acc_ref: (1, tm)     f32 accumulator across the F grid axis
        k = pl.program_id(1)

        @pl.when(k == 0)
        def _():
            acc_ref[...] = jnp.zeros_like(acc_ref)

        x = x_ref[...]
        if mask_f:
            # Ragged final F block: zero the columns that lie beyond
            # feature_dim so unspecified padding cannot contaminate real rows.
            col = k * tf + lax.broadcasted_iota(jnp.int32, (1, tf), 1)
            x = jnp.where(col < feature_dim, x, 0)

        # Contract over F (last dim of both operands): (sub, tf) x (tm, tf)
        # -> (sub, tm), f32 accumulation on the MXU.
        scores = lax.dot_general(
            w_ref[...],
            x,
            dimension_numbers=(((1,), (1,)), ((), ())),
            preferred_element_type=jnp.float32,
        )
        acc_ref[...] += scores[0:1, :]

        @pl.when(k == pl.num_programs(1) - 1)
        def _():
            out = acc_ref[...] + b_ref[0]                  # (1, tm), f32
            o_ref[...] = out[None].astype(o_ref.dtype)     # (1, 1, tm)

    return kernel


def gene_set_score_linear(x, weight, bias, *, tm=None, tf=None):
    """
    x:      (batch_size, num_gene_sets, feature_dim)
    weight: (1, feature_dim)   -- torch nn.Linear weight layout
    bias:   (1,)               -- torch nn.Linear bias
    returns (batch_size, num_gene_sets)
    """
    batch_size, num_gene_sets, feature_dim = x.shape
    m = batch_size * num_gene_sets

    x_flat = x.reshape(m, feature_dim)  # matches torch x.view(-1, F)
    itemsize = jnp.dtype(x.dtype).itemsize
    sub = _sublanes_for_itemsize(itemsize)

    vmem_limit, per_buffer = _vmem_budget()
    tm_auto, tf_auto = _choose_tiles(m, feature_dim, itemsize, per_buffer)
    if tm is None:
        tm = tm_auto
    if tf is None:
        tf = tf_auto

    grid_m = pl.cdiv(m, tm)           # ragged last row block: no host-side pad
    grid_f = pl.cdiv(feature_dim, tf)
    f_pad = grid_f * tf
    mask_f = f_pad != feature_dim

    # Lane-dense weight slab: `sub` identical sublane rows of the (F,) weight.
    w_slab = jnp.broadcast_to(
        weight.reshape(1, feature_dim).astype(x.dtype), (sub, feature_dim)
    )
    if mask_f:
        # Tiny array; zero-pad so every weight block is fully in-bounds.
        w_slab = jnp.pad(w_slab, ((0, 0), (0, f_pad - feature_dim)))
    w_slab = jnp.asarray(w_slab)
    bias_f32 = jnp.asarray(bias, dtype=jnp.float32).reshape(1)

    kernel = _make_kernel(feature_dim, tf, mask_f)

    out = pl.pallas_call(
        kernel,
        out_shape=jax.ShapeDtypeStruct((grid_m, 1, tm), x.dtype),
        grid_spec=pltpu.PrefetchScalarGridSpec(
            num_scalar_prefetch=0,
            grid=(grid_m, grid_f),
            in_specs=[
                pl.BlockSpec(memory_space=pltpu.SMEM),                 # bias
                pl.BlockSpec((tm, tf), lambda i, k: (i, k)),           # x tile
                pl.BlockSpec((sub, tf), lambda i, k: (0, k)),          # weight
            ],
            out_specs=pl.BlockSpec((1, 1, tm), lambda i, k: (i, 0, 0)),
            scratch_shapes=[pltpu.VMEM((1, tm), jnp.float32)],
        ),
        compiler_params=pltpu.CompilerParams(
            dimension_semantics=("parallel", "arbitrary"),
            vmem_limit_bytes=vmem_limit,
        ),
    )(bias_f32, x_flat, w_slab)

    scores_flat = out.reshape(grid_m * tm)[:m]
    return scores_flat.reshape(batch_size, num_gene_sets)


def _reference(x, weight, bias):
    # Pure element-wise f32 reference (no MXU) for correctness checks.
    f = x.shape[-1]
    return (x * weight.reshape(1, 1, f)).sum(axis=-1) + bias[0]


if __name__ == "__main__":
    key = jax.random.PRNGKey(0)
    kx, kw, kb, kx2, kx3, kw3 = jax.random.split(key, 6)

    # Case 1: small, aligned shapes; default (single-tile) tiling.
    batch_size, num_gene_sets, feature_dim = 2, 64, 128
    x = jax.random.normal(
        kx, (batch_size, num_gene_sets, feature_dim), dtype=jnp.float32
    )

    # Deterministic nn.Linear-style init: U(-1/sqrt(F), 1/sqrt(F)).
    bound = 1.0 / math.sqrt(feature_dim)
    weight = jax.random.uniform(
        kw, (1, feature_dim), dtype=jnp.float32, minval=-bound, maxval=bound
    )
    bias = jax.random.uniform(
        kb, (1,), dtype=jnp.float32, minval=-bound, maxval=bound
    )

    scores = jax.block_until_ready(gene_set_score_linear(x, weight, bias))
    ref = _reference(x, weight, bias)
    assert scores.shape == (batch_size, num_gene_sets)
    assert jnp.allclose(scores, ref, atol=1e-4, rtol=1e-4)

    # Case 2: non-divisible M with a forced small tile -> exercises the ragged
    # last row block (no host-side pad) and the slice-back path.
    b2, n2 = 2, 100
    x2 = jax.random.normal(kx2, (b2, n2, feature_dim), dtype=jnp.float32)
    scores2 = jax.block_until_ready(
        gene_set_score_linear(x2, weight, bias, tm=64)
    )
    ref2 = _reference(x2, weight, bias)
    assert scores2.shape == (b2, n2)
    assert jnp.allclose(scores2, ref2, atol=1e-4, rtol=1e-4)

    # Case 3: split-F path with a non-divisible feature dim -> exercises the
    # inner "arbitrary" F axis, the f32 accumulator, and in-kernel F masking.
    b3, n3, f3 = 2, 32, 320
    x3 = jax.random.normal(kx3, (b3, n3, f3), dtype=jnp.float32)
    bound3 = 1.0 / math.sqrt(f3)
    weight3 = jax.random.uniform(
        kw3, (1, f3), dtype=jnp.float32, minval=-bound3, maxval=bound3
    )
    scores3 = jax.block_until_ready(
        gene_set_score_linear(x3, weight3, bias, tm=64, tf=128)
    )
    ref3 = _reference(x3, weight3, bias)
    assert scores3.shape == (b3, n3)
    assert jnp.allclose(scores3, ref3, atol=1e-4, rtol=1e-4)

    print("KERNEL_OK")
</pallas_src>

<mosaic_0001>
module attributes {stable_mosaic.version = 11 : i64} {
  func.func @kernel(%arg0: i32, %arg1: i32, %arg2: memref<1xf32, #tpu.memory_space<smem>>, %arg3: memref<128x128xf32, #tpu.memory_space<vmem>>, %arg4: memref<8x128xf32, #tpu.memory_space<vmem>>, %arg5: memref<1x1x128xf32, #tpu.memory_space<vmem>>, %arg6: memref<1x128xf32, #tpu.memory_space<vmem>>) attributes {dimension_semantics = [#tpu.dimension_semantics<parallel>, #tpu.dimension_semantics<arbitrary>], iteration_bounds = array<i64: 1, 1>, scalar_prefetch = 0 : i64, scratch_operands = 1 : i64, tpu.core_type = #tpu.core_type<tc>, window_params = [{transform_indices = @transform_0, window_bounds = array<i64: 1>}, {transform_indices = @transform_1, window_bounds = array<i64: 128, 128>}, {transform_indices = @transform_2, window_bounds = array<i64: 8, 128>}, {transform_indices = @transform_3, window_bounds = array<i64: 1, 1, 128>}]} {
    %c0_i32 = arith.constant 0 : i32
    %0 = arith.cmpi eq, %arg1, %c0_i32 : i32
    %1 = arith.extui %0 : i1 to i32
    %c0_i32_0 = arith.constant 0 : i32
    %2 = arith.cmpi ne, %1, %c0_i32_0 : i32
    scf.if %2 {
      %cst_10 = arith.constant 0.000000e+00 : f32
      %13 = vector.broadcast %cst_10 : f32 to vector<1x128xf32>
      %c0_11 = arith.constant 0 : index
      %c0_12 = arith.constant 0 : index
      %14 = vector.load %arg6[%c0_11, %c0_12] : memref<1x128xf32, #tpu.memory_space<vmem>>, vector<1x128xf32>
      tpu.vector_store %arg6[%c0_11, %c0_12], %13 {strides = array<i32>} : memref<1x128xf32, #tpu.memory_space<vmem>>, vector<1x128xf32>,
    } else {
    }
    %c0 = arith.constant 0 : index
    %c0_1 = arith.constant 0 : index
    %3 = vector.load %arg3[%c0, %c0_1] : memref<128x128xf32, #tpu.memory_space<vmem>>, vector<128x128xf32>
    %c0_2 = arith.constant 0 : index
    %c0_3 = arith.constant 0 : index
    %4 = vector.load %arg4[%c0_2, %c0_3] : memref<8x128xf32, #tpu.memory_space<vmem>>, vector<8x128xf32>
    %cst = arith.constant dense<0.000000e+00> : vector<8x128xf32>
    %5 = tpu.matmul %4, %3, %cst {dimension_numbers = #tpu.dot_dimension_numbers<[1], [1], [0], [0], [0, 0, 1, 0], [], []>} : vector<8x128xf32>, vector<128x128xf32>, vector<8x128xf32> -> vector<8x128xf32>
    %c0_4 = arith.constant 0 : index
    %c0_5 = arith.constant 0 : index
    %6 = vector.load %arg6[%c0_4, %c0_5] : memref<1x128xf32, #tpu.memory_space<vmem>>, vector<1x128xf32>
    %7 = vector.extract_strided_slice %5 {offsets = [0, 0], sizes = [1, 128], strides = [1, 1]} : vector<8x128xf32> to vector<1x128xf32>
    %8 = arith.addf %6, %7 : vector<1x128xf32>
    %c0_6 = arith.constant 0 : index
    %c0_7 = arith.constant 0 : index
    %9 = vector.load %arg6[%c0_6, %c0_7] : memref<1x128xf32, #tpu.memory_space<vmem>>, vector<1x128xf32>
    tpu.vector_store %arg6[%c0_6, %c0_7], %8 {strides = array<i32>} : memref<1x128xf32, #tpu.memory_space<vmem>>, vector<1x128xf32>,
    %c0_i32_8 = arith.constant 0 : i32
    %10 = arith.cmpi eq, %arg1, %c0_i32_8 : i32
    %11 = arith.extui %10 : i1 to i32
    %c0_i32_9 = arith.constant 0 : i32
    %12 = arith.cmpi ne, %11, %c0_i32_9 : i32
    scf.if %12 {
      %c0_10 = arith.constant 0 : index
      %c0_11 = arith.constant 0 : index
      %13 = vector.load %arg6[%c0_10, %c0_11] : memref<1x128xf32, #tpu.memory_space<vmem>>, vector<1x128xf32>
      %c0_12 = arith.constant 0 : index
      %14 = memref.load %arg2[%c0_12] : memref<1xf32, #tpu.memory_space<smem>>
      %15 = vector.broadcast %14 : f32 to vector<1x128xf32>
      %16 = arith.addf %13, %15 : vector<1x128xf32>
      %17 = vector.shape_cast %16 : vector<1x128xf32> to vector<1x1x128xf32>
      %c0_13 = arith.constant 0 : index
      %c0_14 = arith.constant 0 : index
      %c0_15 = arith.constant 0 : index
      %18 = vector.load %arg5[%c0_13, %c0_14, %c0_15] : memref<1x1x128xf32, #tpu.memory_space<vmem>>, vector<1x1x128xf32>
      tpu.vector_store %arg5[%c0_13, %c0_14, %c0_15], %17 {strides = array<i32>} : memref<1x1x128xf32, #tpu.memory_space<vmem>>, vector<1x1x128xf32>,
    } else {
    }
    return
  }
  func.func @transform_0(%arg0: i32, %arg1: i32) -> i32 {
    %c0_i32 = arith.constant 0 : i32
    %c0_i32_0 = arith.constant 0 : i32
    return %c0_i32 : i32
  }
  func.func @transform_1(%arg0: i32, %arg1: i32) -> (i32, i32) {
    %c0_i32 = arith.constant 0 : i32
    return %arg0, %arg1 : i32, i32
  }
  func.func @transform_2(%arg0: i32, %arg1: i32) -> (i32, i32) {
    %c0_i32 = arith.constant 0 : i32
    %c0_i32_0 = arith.constant 0 : i32
    return %c0_i32, %arg1 : i32, i32
  }
  func.func @transform_3(%arg0: i32, %arg1: i32) -> (i32, i32, i32) {
    %c0_i32 = arith.constant 0 : i32
    %c0_i32_0 = arith.constant 0 : i32
    %c0_i32_1 = arith.constant 0 : i32
    return %arg0, %c0_i32, %c0_i32_0 : i32, i32, i32
  }
}

</mosaic_0001>

<bundles_post_ra>
// kernel: tpu_custom_call.1
= control target key start
LH: loop header
LB: loop body
LE: loop exit
PB: predicated region body
PF: predicated region fallthrough
CT: control target
= control target key end

     0   :  { %9 = vsyncpa [#allocation5], 0  ;;  %s325_s0 = inlined_call_operand.<no memory space> [shape: f32[1], index: 0, kind: input, shape index: {}]   ;;  %s326_s1 = inlined_call_operand.hbm [shape: f32[128,128], index: 1, kind: input, shape index: {}]   ;;  %s327_s2 = inlined_call_operand.hbm [shape: f32[8,128], index: 2, kind: input, shape index: {}]   ;;  %s328_s3 = inlined_call_operand.hbm [shape: f32[1,1,128], index: 3, kind: output, shape index: {}]  }
   0x1   :  { %10 = vsyncpa [#allocation8], 0 }
   0x2   :  { %11 = vsyncpa [#allocation6], 0  ;;  %s286_s12 = smov [#allocation4]  }
   0x3   :  { %s19_s13 = sshll.u32 %s286_s12, 4  ;;  %s20_s13 = int_to_ptr.vmem [resolvable:$true] %s19_s13 }
   0x4   :  { %s228_s14 = scalar_lea.vmem %s20_s13, 2048  ;;  %p233_p1 = scmp.lt.s32.totalorder %s20_s13, %s20_s13 }
   0x5   :  { %p229_p0 = scmp.ne.s32.totalorder %s20_s13, %s228_s14  ;;  %p234_p2 = scmp.lt.s32.totalorder %s228_s14, %s228_s14 }
   0x7   :  { %p235_p3 = por %p234_p2, %p233_p1 }
   0x9   :  { %p236_p4 = pnand %p235_p3, %p229_p0 }
   0xb   :  { %239 = shalt.err (!%p236_p4)
}
   0xc   :  { %s287_s15 = smov 128   ;;  %s288_s16 = smov 8  }
   0xd   :  { %25 = dma.hbm_to_vmem [thread:$0]  %s326_s1, 2048, %s20_s13, [#allocation5], %s287_s15, %s287_s15, %s288_s16  }
   0xe   :  { %s289_s19 = smov [#allocation7]  }
   0xf   :  { %s32_s20 = sshll.u32 %s289_s19, 4  ;;  %s33_s20 = int_to_ptr.vmem [resolvable:$true] %s32_s20 }
  0x10   :  { %s248_s21 = scalar_lea.vmem %s33_s20, 128  ;;  %p253_p6 = scmp.lt.s32.totalorder %s33_s20, %s33_s20 }
  0x11   :  { %p249_p5 = scmp.ne.s32.totalorder %s33_s20, %s248_s21  ;;  %p254_p7 = scmp.lt.s32.totalorder %s248_s21, %s248_s21 }
  0x13   :  { %p255_p8 = por %p254_p7, %p253_p6 }
  0x15   :  { %p256_p9 = pnand %p255_p8, %p249_p5 }
  0x17   :  { %259 = shalt.err (!%p256_p9)
}
  0x18   :  { %35 = dma.hbm_to_vmem [thread:$0]  %s327_s2, 128, %s33_s20, [#allocation8]  }
  0x19   :  { %280 = dma.done.wait [#allocation5], 2048  }
  0x1a   :  { %281 = vsyncadd [#allocation5], 4294965248 }
  0x1b   :  { %282 = dma.done.wait [#allocation8], 128  }
  0x1c   :  { %283 = vsyncadd [#allocation8], 4294967168  ;;  %v290_v0 = vmov 0.0   ;;  %vm291_vm0 = vmmov 0   ;;  %v62_v1 = vld [vmem:[#allocation4 + $0x78] sm:$0xff]  ;;  %v61_v2 = vld [vmem:[#allocation4 + $0x70] sm:$0xff]  ;;  %v142_v22 = vstv %s325_s0 }
  0x1d   :  { %178 = vmatprep.subr.mxu0 %v290_v0  ;;  %46 = vst [vmem:[#allocation2] sm:$0x1] %v290_v0  ;;  %210 = vmatprep.mubr.msk.f32.mxu0 %vm291_vm0, %v290_v0  ;;  %v60_v3 = vld [vmem:[#allocation4 + $0x68] sm:$0xff]  ;;  %v59_v4 = vld [vmem:[#allocation4 + $0x60] sm:$0xff]  ;;  %v58_v5 = vld [vmem:[#allocation4 + $0x58] sm:$0xff]  ;;  %s292_s24 = smov [#allocation9]  }
  0x1e   :  { %179 = vmatpush3.xpose.msra.mxu0 %v62_v1  ;;  %v57_v6 = vld [vmem:[#allocation4 + $0x50] sm:$0xff]  ;;  %v56_v7 = vld [vmem:[#allocation4 + $0x48] sm:$0xff]  ;;  %v55_v8 = vld [vmem:[#allocation4 + $0x40] sm:$0xff]  ;;  %s151_s25 = sshll.u32 %s292_s24, 4  ;;  %s152_s25 = int_to_ptr.vmem [resolvable:$true] %s151_s25 }
  0x1f   :  { %180 = vmatprep.subr.mxu0 %v290_v0  ;;  %v54_v9 = vld [vmem:[#allocation4 + $0x38] sm:$0xff]  ;;  %v53_v10 = vld [vmem:[#allocation4 + $0x30] sm:$0xff]  ;;  %v52_v11 = vld [vmem:[#allocation4 + $0x28] sm:$0xff]  ;;  %s260_s26 = scalar_lea.vmem %s152_s25, 16  ;;  %s264_s27 = scalar_lea.vmem %s152_s25, 32 }
  0x20   :  { %v51_v12 = vld [vmem:[#allocation4 + $0x20] sm:$0xff]  ;;  %v50_v13 = vld [vmem:[#allocation4 + $0x18] sm:$0xff]  ;;  %v49_v14 = vld [vmem:[#allocation4 + $0x10] sm:$0xff]  ;;  %p261_p10 = scmp.ne.s32.totalorder %s152_s25, %s260_s26  ;;  %p265_p11 = scmp.lt.s32.totalorder %s152_s25, %s152_s25 }
  0x21   :  { %v48_v15 = vld [vmem:[#allocation4 + $0x8] sm:$0xff]  ;;  %v47_v16 = vld [vmem:[#allocation4] sm:$0xff]  ;;  %p266_p12 = scmp.lt.s32.totalorder %s264_s27, %s260_s26 }
  0x22   :  { %181 = vmatpush3.xpose.msra.mxu0 %v61_v2  ;;  %v63_v17 = vld [vmem:[#allocation7] sm:$0xff] }
  0x23   :  { %182 = vmatprep.subr.mxu0 %v290_v0  ;;  %p267_p13 = por %p266_p12, %p265_p11 }
  0x24   :  { %v134_v18 = vld [vmem:[#allocation2] sm:$0x1] }
  0x25   :  { %p268_p0 = pnand %p267_p13, %p261_p10 }
  0x26   :  { %183 = vmatpush3.xpose.msra.mxu0 %v60_v3 }
  0x27   :  { %184 = vmatprep.subr.mxu0 %v290_v0 }
  0x2a   :  { %185 = vmatpush3.xpose.msra.mxu0 %v59_v4 }
  0x2b   :  { %186 = vmatprep.subr.mxu0 %v290_v0 }
  0x2e   :  { %187 = vmatpush3.xpose.msra.mxu0 %v58_v5 }
  0x2f   :  { %188 = vmatprep.subr.mxu0 %v290_v0 }
  0x32   :  { %189 = vmatpush3.xpose.msra.mxu0 %v57_v6 }
  0x33   :  { %190 = vmatprep.subr.mxu0 %v290_v0 }
  0x36   :  { %191 = vmatpush3.xpose.msra.mxu0 %v56_v7 }
  0x37   :  { %192 = vmatprep.subr.mxu0 %v290_v0 }
  0x3a   :  { %193 = vmatpush3.xpose.msra.mxu0 %v55_v8 }
  0x3b   :  { %194 = vmatprep.subr.mxu0 %v290_v0 }
  0x3e   :  { %195 = vmatpush3.xpose.msra.mxu0 %v54_v9 }
  0x3f   :  { %196 = vmatprep.subr.mxu0 %v290_v0 }
  0x42   :  { %197 = vmatpush3.xpose.msra.mxu0 %v53_v10 }
  0x43   :  { %198 = vmatprep.subr.mxu0 %v290_v0 }
  0x46   :  { %199 = vmatpush3.xpose.msra.mxu0 %v52_v11 }
  0x47   :  { %200 = vmatprep.subr.mxu0 %v290_v0 }
  0x4a   :  { %201 = vmatpush3.xpose.msra.mxu0 %v51_v12 }
  0x4b   :  { %202 = vmatprep.subr.mxu0 %v290_v0 }
  0x4e   :  { %203 = vmatpush3.xpose.msra.mxu0 %v50_v13 }
  0x4f   :  { %204 = vmatprep.subr.mxu0 %v290_v0 }
  0x52   :  { %205 = vmatpush3.xpose.msra.mxu0 %v49_v14 }
  0x53   :  { %206 = vmatprep.subr.mxu0 %v290_v0 }
  0x56   :  { %207 = vmatpush3.xpose.msra.mxu0 %v48_v15 }
  0x57   :  { %208 = vmatprep.subr.mxu0 %v290_v0 }
  0x5a   :  { %209 = vmatpush3.xpose.msra.mxu0 %v47_v16 }
  0x5d   :  { %211 = vmatmul.mubr.f32.vlgmr.msra.gmra.mxu0 %v63_v17 }
 0x11d   :  { %v130_v19 = vpop.f32.mrf.mxu0 }
 0x11e   :  { %v135_v20 = vadd.f32 %v134_v18, %v130_v19 }
 0x11f   :  { %v212_v21 = vpop.f32.mrf.mxu0 }
 0x120   :  { %136 = vst [vmem:[#allocation2] sm:$0x1] %v135_v20 }
 0x127   :  { %v140_v23 = vld [vmem:[#allocation2] sm:$0x1] }
 0x128   :  { %v143_v24 = vadd.f32 %v142_v22, %v140_v23 }
 0x12a   :  { %144 = vst [vmem:[#allocation9] sm:$0x1] %v143_v24 }
 0x12b   :  { %271 = shalt.err (!%p268_p0)
}
 0x12c   :  { %154 = dma.vmem_to_hbm [thread:$0]  %s152_s25, 16, %s328_s3, [#allocation6]  }
 0x12d   :  { %284 = dma.done.wait [#allocation6], 16  }
 0x12e   :  { %285 = vsyncadd [#allocation6], 4294967280 }
 0x12f   :  { %158 = vsyncpa [#allocation5], 1 }
 0x130   :  { %159 = vsyncpa [#allocation8], 1 }
 0x131   :  { %160 = vsyncpa [#allocation6], 1 }

</bundles_post_ra>
